<compile_context>
chip_gen: v6e
topology: v6e:2x2x1
jax: 0.10.0
libtpu: 0.0.40
codegen_flags: <defaults>
</compile_context>

<pallas_src>
import jax
import jax.numpy as jnp
from jax.experimental import pallas as pl
from jax.experimental.pallas import tpu as pltpu


def _pick_rows_per_step(n, v_pad, requested):
    """Rows (K) per grid step: ~2 MiB of lane-dense logits per step, clamped."""
    if requested is None:
        k = (2 * 1024 * 1024) // (v_pad * 4)
    else:
        k = requested
    k = max(8, min(int(k), 4096))
    k = min(k, max(8, pl.cdiv(n, 8) * 8))      # don't tile far past N
    if k >= 256:
        k = (k // 256) * 256                   # MXU-friendly row tiles
    else:
        k = max(8, (k // 8) * 8)               # sublane-aligned
    return int(k)


def _make_logits_kernel(v_rows):
    """Gather K rows of the VMEM-resident table via an exact one-hot matmul."""

    def kernel(idx_ref, table_ref, logits_ref):
        ids = idx_ref[...]                                     # (K, 1) int32
        k = ids.shape[0]
        onehot = (jax.lax.broadcasted_iota(jnp.int32, (k, v_rows), 1) == ids
                  ).astype(jnp.float32)
        logits_ref[...] = jnp.dot(onehot, table_ref[...],
                                  preferred_element_type=jnp.float32,
                                  precision=jax.lax.Precision.HIGHEST)

    return kernel


def _make_loss_kernel(n_valid, v, v_rows, v_pad):
    """Gather + fused cross-entropy.  Emits per-step partial NLL sums so the
    grid axis stays 'parallel' (the mean is finished in the wrapper)."""

    def kernel(meta_ref, table_ref, logits_ref, partial_ref):
        i = pl.program_id(0)
        meta = meta_ref[...]                                   # (K, 2) int32
        ids = meta[:, 0:1]                                     # (K, 1)
        tgt = meta[:, 1:2]                                     # (K, 1)
        k = ids.shape[0]

        onehot = (jax.lax.broadcasted_iota(jnp.int32, (k, v_rows), 1) == ids
                  ).astype(jnp.float32)
        logits = jnp.dot(onehot, table_ref[...],
                         preferred_element_type=jnp.float32,
                         precision=jax.lax.Precision.HIGHEST)  # (K, v_pad)
        logits_ref[...] = logits           # single full-tile lane-dense store

        lane = jax.lax.broadcasted_iota(jnp.int32, (k, v_pad), 1)
        # Mask the zero-padded lanes (columns >= v) out of the softmax.
        z = jnp.where(lane < v, logits, jnp.float32(-1e30)) if v < v_pad else logits
        m = jnp.max(z, axis=-1, keepdims=True)                 # (K, 1)
        lse = m + jnp.log(jnp.sum(jnp.exp(z - m), axis=-1, keepdims=True))
        # NOTE: targets are assumed to lie in [0, v) (PyTorch would raise on
        # out-of-range targets; here they would silently contribute 0).
        picked = jnp.sum(jnp.where(lane == tgt, logits, 0.0),
                         axis=-1, keepdims=True)               # (K, 1)
        nll = lse - picked                                     # (K, 1)

        # Mask rows beyond N (N rounded up to a multiple of K).
        rid = i * k + jax.lax.broadcasted_iota(jnp.int32, (k, 1), 0)
        nll = jnp.where(rid < n_valid, nll, 0.0)
        partial_ref[...] = jnp.broadcast_to(jnp.sum(nll, keepdims=True),
                                            partial_ref.shape)

    return kernel


def bigram_forward(idx, table, targets=None, rows_per_step=None):
    """Pallas equivalent of BingramLanguageModel.forward.

    idx, targets: (B, T) integer token ids.  table: (V, V) f32 embedding table.
    Returns (logits, loss):
      * targets is None -> logits (B, T, V), loss None
      * targets given   -> logits (B*T, V) (PyTorch's .view), scalar loss
    """
    B, T = idx.shape
    V = table.shape[0]
    N = B * T

    V_pad = pl.cdiv(V, 128) * 128          # lane-dense logits width
    V_rows = pl.cdiv(V, 8) * 8             # sublane-aligned table rows

    K = _pick_rows_per_step(N, V_pad, rows_per_step)
    num_steps = pl.cdiv(N, K)
    N_pad = num_steps * K

    table_bytes = V_rows * V_pad * 4
    # TODO(synk): for vocabularies whose padded table does not fit in VMEM,
    # switch to a memory_space=pl.ANY table + manual make_async_copy row gather.
    if table_bytes > 20 * 1024 * 1024:
        raise NotImplementedError("vocab too large for the VMEM-resident-table path")

    table_p = jnp.pad(table.astype(jnp.float32),
                      ((0, V_rows - V), (0, V_pad - V)))

    # Conservative VMEM estimate: resident table, double-buffered logits out
    # block, kernel intermediates, tiny id/target blocks.
    out_block_bytes = K * V_pad * 4
    est_vmem = 2 * table_bytes + 4 * out_block_bytes + 4 * K * 8
    vmem_limit = None
    if est_vmem > 12 * 1024 * 1024:
        # Safe on all generations: well under v7x's 64 MiB physical VMEM.
        vmem_limit = min(48 * 1024 * 1024, max(32 * 1024 * 1024, 2 * est_vmem))
    cparams = pltpu.CompilerParams(dimension_semantics=("parallel",),
                                   vmem_limit_bytes=vmem_limit)

    table_spec = pl.BlockSpec((V_rows, V_pad), lambda i: (0, 0))   # VMEM-resident
    logits_spec = pl.BlockSpec((K, V_pad), lambda i: (i, 0))
    logits_shape = jax.ShapeDtypeStruct((N_pad, V_pad), jnp.float32)

    # Flattened token ids, padded to a multiple of K (pad id 0 is a valid row;
    # padded rows are masked out of the loss and sliced out of the logits).
    idx_flat = jnp.pad(idx.reshape(-1).astype(jnp.int32), (0, N_pad - N))

    if targets is None:
        idx_col = idx_flat.reshape(N_pad, 1)
        logits_pad = pl.pallas_call(
            _make_logits_kernel(V_rows),
            out_shape=logits_shape,
            grid=(num_steps,),
            in_specs=[pl.BlockSpec((K, 1), lambda i: (i, 0)), table_spec],
            out_specs=logits_spec,
            compiler_params=cparams,
        )(idx_col, table_p)
        return logits_pad[:N, :V].reshape(B, T, V), None

    tgt_flat = jnp.pad(targets.reshape(-1).astype(jnp.int32), (0, N_pad - N))
    meta = jnp.stack([idx_flat, tgt_flat], axis=-1)                # (N_pad, 2)

    partial_shape = jax.ShapeDtypeStruct((num_steps * 8, 128), jnp.float32)
    logits_pad, partials = pl.pallas_call(
        _make_loss_kernel(N, V, V_rows, V_pad),
        out_shape=(logits_shape, partial_shape),
        grid=(num_steps,),
        in_specs=[pl.BlockSpec((K, 2), lambda i: (i, 0)), table_spec],
        out_specs=(logits_spec, pl.BlockSpec((8, 128), lambda i: (i, 0))),
        compiler_params=cparams,
    )(meta, table_p)

    # Finish the mean in XLA (tree sum over per-step partials).
    loss = partials.reshape(num_steps, 8, 128)[:, 0, 0].sum() / jnp.float32(N)

    # TODO(synk): a loss-only variant (or bf16 logits) would remove/halve the
    # dominant N*V_pad*4 B logits writeback when callers only need the loss;
    # the [:N, :V] slice below costs an extra XLA copy but is required to match
    # the PyTorch (B*T, C) view exactly.
    return logits_pad[:N, :V], loss


def _reference_forward(idx, table, targets):
    logits3d = table[idx]                                   # (B, T, V)
    B, T, V = logits3d.shape
    l2 = logits3d.reshape(B * T, V)
    t = targets.reshape(-1)
    logp = jax.nn.log_softmax(l2, axis=-1)
    loss = -jnp.mean(logp[jnp.arange(B * T), t])
    return logits3d, l2, loss


if __name__ == "__main__":
    vocab_size = 32
    B, T = 2, 8

    key = jax.random.PRNGKey(0)
    k_tab, k_idx, k_tgt = jax.random.split(key, 3)

    # nn.Embedding default init: N(0, 1)
    table = jax.random.normal(k_tab, (vocab_size, vocab_size), dtype=jnp.float32)
    idx = jax.random.randint(k_idx, (B, T), 0, vocab_size, dtype=jnp.int32)
    targets = jax.random.randint(k_tgt, (B, T), 0, vocab_size, dtype=jnp.int32)

    # targets=None path (logits only)
    logits_only, loss_none = bigram_forward(idx, table, targets=None)
    jax.block_until_ready(logits_only)
    assert loss_none is None
    assert logits_only.shape == (B, T, vocab_size)

    # targets path (logits + cross-entropy loss)
    logits, loss = bigram_forward(idx, table, targets=targets)
    jax.block_until_ready((logits, loss))
    assert logits.shape == (B * T, vocab_size)

    ref3d, ref2d, ref_loss = _reference_forward(idx, table, targets)
    assert jnp.allclose(logits_only, ref3d, atol=1e-5), "logits (no-target) mismatch"
    assert jnp.allclose(logits, ref2d, atol=1e-5), "logits (target path) mismatch"
    assert jnp.allclose(loss, ref_loss, atol=1e-5), "loss mismatch"

    # TODO(synk): generate() uses torch.multinomial autoregressive sampling;
    # that host-side control-flow loop is not part of the kernel hot path.
    print("KERNEL_OK")
</pallas_src>

<mosaic_0001>
module attributes {stable_mosaic.version = 11 : i64} {
  func.func @kernel(%arg0: i32, %arg1: memref<16x1xi32, #tpu.memory_space<vmem>>, %arg2: memref<32x128xf32, #tpu.memory_space<vmem>>, %arg3: memref<16x128xf32, #tpu.memory_space<vmem>>) attributes {dimension_semantics = [#tpu.dimension_semantics<parallel>], iteration_bounds = array<i64: 1>, scalar_prefetch = 0 : i64, scratch_operands = 0 : i64, tpu.core_type = #tpu.core_type<tc>, window_params = [{transform_indices = @transform_0, window_bounds = array<i64: 16, 1>}, {pipeline_mode = #tpu.pipeline_mode<synchronous>, transform_indices = @transform_1, window_bounds = array<i64: 32, 128>}, {transform_indices = @transform_2, window_bounds = array<i64: 16, 128>}]} {
    %c0 = arith.constant 0 : index
    %c0_0 = arith.constant 0 : index
    %0 = vector.load %arg1[%c0, %c0_0] : memref<16x1xi32, #tpu.memory_space<vmem>>, vector<16x1xi32>
    %1 = tpu.iota {dimensions = array<i32: 1>} : vector<16x32xi32>
    %2 = vector.broadcast %0 : vector<16x1xi32> to vector<16x32xi32>
    %3 = arith.cmpi eq, %1, %2 : vector<16x32xi32>
    %4 = arith.extui %3 : vector<16x32xi1> to vector<16x32xi32>
    %5 = arith.sitofp %4 : vector<16x32xi32> to vector<16x32xf32>
    %c0_1 = arith.constant 0 : index
    %c0_2 = arith.constant 0 : index
    %6 = vector.load %arg2[%c0_1, %c0_2] : memref<32x128xf32, #tpu.memory_space<vmem>>, vector<32x128xf32>
    %cst = arith.constant dense<0.000000e+00> : vector<16x128xf32>
    %7 = tpu.matmul %5, %6, %cst {dimension_numbers = #tpu.dot_dimension_numbers<[1], [0], [0], [1], [0, 0, 1, 1], [], []>, precision = #tpu.contract_precision<fp32>} : vector<16x32xf32>, vector<32x128xf32>, vector<16x128xf32> -> vector<16x128xf32>
    %c0_3 = arith.constant 0 : index
    %c0_4 = arith.constant 0 : index
    %8 = vector.load %arg3[%c0_3, %c0_4] : memref<16x128xf32, #tpu.memory_space<vmem>>, vector<16x128xf32>
    tpu.vector_store %arg3[%c0_3, %c0_4], %7 {strides = array<i32>} : memref<16x128xf32, #tpu.memory_space<vmem>>, vector<16x128xf32>,
    return
  }
  func.func @transform_0(%arg0: i32) -> (i32, i32) {
    %c0_i32 = arith.constant 0 : i32
    %c0_i32_0 = arith.constant 0 : i32
    return %arg0, %c0_i32 : i32, i32
  }
  func.func @transform_1(%arg0: i32) -> (i32, i32) {
    %c0_i32 = arith.constant 0 : i32
    %c0_i32_0 = arith.constant 0 : i32
    %c0_i32_1 = arith.constant 0 : i32
    return %c0_i32, %c0_i32_0 : i32, i32
  }
  func.func @transform_2(%arg0: i32) -> (i32, i32) {
    %c0_i32 = arith.constant 0 : i32
    %c0_i32_0 = arith.constant 0 : i32
    return %arg0, %c0_i32 : i32, i32
  }
}

</mosaic_0001>

<bundles_post_ra>
// kernel: tpu_custom_call.1
= control target key start
LH: loop header
LB: loop body
LE: loop exit
PB: predicated region body
PF: predicated region fallthrough
CT: control target
= control target key end

     0   :  { %7 = vsyncpa [#allocation3], 0  ;;  %s888_s0 = inlined_call_operand.vmem [shape: s32[16,1], index: 0, kind: input, shape index: {}]   ;;  %s889_s1 = inlined_call_operand.hbm [shape: f32[32,128], index: 1, kind: input, shape index: {}]   ;;  %s890_s2 = inlined_call_operand.hbm [shape: f32[16,128], index: 2, kind: output, shape index: {}]  }
   0x1   :  { %8 = vsyncpa [#allocation4], 0  ;;  %s761_s9 = smov [#allocation2]  }
   0x2   :  { %s16_s10 = sshll.u32 %s761_s9, 4  ;;  %s17_s10 = int_to_ptr.vmem [resolvable:$true] %s16_s10 }
   0x3   :  { %s725_s11 = scalar_lea.vmem %s17_s10, 512  ;;  %p730_p1 = scmp.lt.s32.totalorder %s17_s10, %s17_s10 }
   0x4   :  { %p726_p0 = scmp.ne.s32.totalorder %s17_s10, %s725_s11  ;;  %p731_p2 = scmp.lt.s32.totalorder %s725_s11, %s725_s11 }
   0x6   :  { %p732_p3 = por %p731_p2, %p730_p1 }
   0x8   :  { %p733_p4 = pnand %p732_p3, %p726_p0 }
   0xa   :  { %736 = shalt.err (!%p733_p4)
}
   0xb   :  { %s762_s12 = smov 128   ;;  %s763_s13 = smov 8  }
   0xc   :  { %22 = dma.hbm_to_vmem [thread:$0]  %s889_s1, 512, %s17_s10, [#allocation3], %s762_s12, %s762_s12, %s763_s13  }
   0xd   :  { %757 = dma.done.wait [#allocation3], 512  }
   0xe   :  { %758 = vsyncadd [#allocation3], 4294966784  ;;  %v764_v0 = vmov 0   ;;  %v26_v1 = vld [vmem:[%s888_s0] sm:$0xff]  ;;  %v45_v2 = vld [vmem:[#allocation2 + $0x18] sm:$0xff]  ;;  %v28_v27 = vlaneseq  ;;  %vm46_vm0 = vcmask 261120  }
   0xf   :  { %716 = vset.pattern.permute.xlu0 %v764_v0  ;;  %v791_v3 = vand.u32 4294901760, %v45_v2  ;;  %v44_v4 = vld [vmem:[#allocation2 + $0x10] sm:$0xff]  ;;  %v43_v5 = vld [vmem:[#allocation2 + $0x8] sm:$0xff]  ;;  %v42_v6 = vld [vmem:[#allocation2] sm:$0xff]  ;;  %v765_v30 = vmov 0.0  }
  0x10   :  { %31 = vperm.xlu0 %716, %v26_v1   ;;  %v27_v7 = vld [vmem:[%s888_s0 + $0x8] sm:$0xff]  ;;  %v796_v8 = vand.u32 4294901760, %v44_v4  ;;  %v798_v9 = vand.u32 4294901760, %v43_v5  ;;  %v800_v10 = vand.u32 4294901760, %v42_v6  ;;  %v29_v28 = vand.u32 127, %v28_v27  ;;  %s766_s0 = smov [#allocation5]  }
  0x11   :  { %v803_v11 = vsub.f32 %v45_v2, %v791_v3  ;;  %644 = vmatprep.subr.mxu0 %v791_v3  ;;  %s588_s1 = sshll.u32 %s766_s0, 4  ;;  %s589_s1 = int_to_ptr.vmem [resolvable:$true] %s588_s1 }
  0x12   :  { %v807_v12 = vsub.f32 %v44_v4, %v796_v8  ;;  %v810_v13 = vsub.f32 %v43_v5, %v798_v9  ;;  %v813_v14 = vsub.f32 %v42_v6, %v800_v10  ;;  %645 = vmatpush3.msra.mxu0 %v791_v3  ;;  %s737_s20 = scalar_lea.vmem %s589_s1, 256  ;;  %p742_p6 = scmp.lt.s32.totalorder %s589_s1, %s589_s1 }
  0x13   :  { %v817_v15 = vand.u32 4294901760, %v803_v11  ;;  %646 = vmatprep.subr.mxu0 %v796_v8  ;;  %p738_p5 = scmp.ne.s32.totalorder %s589_s1, %s737_s20  ;;  %p743_p7 = scmp.lt.s32.totalorder %s737_s20, %s737_s20 }
  0x14   :  { %34 = vperm.xlu0 %716, %v27_v7   ;;  %v821_v16 = vand.u32 4294901760, %v807_v12  ;;  %v824_v17 = vand.u32 4294901760, %v810_v13  ;;  %v827_v18 = vand.u32 4294901760, %v813_v14  ;;  %647 = vmatpush3.msra.mxu0 %v796_v8 }
  0x15   :  { %v170_v19 = vsub.f32 %v803_v11, %v817_v15  ;;  %648 = vmatprep.subr.mxu0 %v798_v9  ;;  %p744_p8 = por %p743_p7, %p742_p6 }
  0x16   :  { %v177_v20 = vsub.f32 %v807_v12, %v821_v16  ;;  %v184_v21 = vsub.f32 %v810_v13, %v824_v17  ;;  %649 = vmatpush3.msra.mxu0 %v798_v9  ;;  %v191_v23 = vsub.f32 %v813_v14, %v827_v18 }
  0x17   :  { %v171_v22 = vand.u32 4294901760, %v170_v19  ;;  %650 = vmatprep.subr.mxu0 %v800_v10  ;;  %p745_p9 = pnand %p744_p8, %p738_p5 }
  0x18   :  { %v178_v24 = vand.u32 4294901760, %v177_v20  ;;  %651 = vmatpush3.msra.mxu0 %v800_v10  ;;  %v185_v25 = vand.u32 4294901760, %v184_v21  ;;  %v192_v26 = vand.u32 4294901760, %v191_v23 }
  0x19   :  { %655 = vmatprep.subr.mxu1 %v171_v22  ;;  %666 = vmatprep.subr.mxu0 %v803_v11 }
  0x1a   :  { %656 = vmatpush3.msra.mxu1 %v171_v22 }
  0x1b   :  { %657 = vmatprep.subr.mxu1 %v178_v24 }
  0x1c   :  { %658 = vmatpush3.msra.mxu1 %v178_v24 }
  0x1d   :  { %659 = vmatprep.subr.mxu1 %v185_v25 }
  0x1e   :  { %660 = vmatpush3.msra.mxu1 %v185_v25 }
  0x1f   :  { %661 = vmatprep.subr.mxu1 %v192_v26 }
  0x20   :  { %662 = vmatpush3.msra.mxu1 %v192_v26 }
  0x21   :  { %677 = vmatprep.subr.mxu1 %v791_v3 }
  0x8b   :  { %v32_v29 = vpop.permute.xlu0 %31 }
  0x8c   :  { %vm36_vm1 = vcmp.eq.s32.totalorder %v29_v28, %v32_v29 }
  0x8d   :  { %v600_v31 = vsel %vm36_vm1, 1.0, %v765_v30 }
  0x8e   :  { %v48_v32 = vsel %vm46_vm0, %v600_v31, 0  ;;  %663 = vmatprep.mubr.msk.f32.mxu1 %vm46_vm0, %v600_v31 }
  0x8f   :  { %v123_v33 = vsub.f32 %v48_v32, %v48_v32  ;;  %v35_v34 = vpop.permute.xlu0 %34 }
  0x90   :  { %vm37_vm2 = vcmp.eq.s32.totalorder %v29_v28, %v35_v34 }
  0x91   :  { %v601_v35 = vsel %vm37_vm2, 1.0, %v765_v30  ;;  %v124_v36 = vand.u32 4294901760, %v123_v33 }
  0x92   :  { %v51_v37 = vsel %vm46_vm0, %v601_v35, 0  ;;  %664 = vmatmul.mubr.msk.f32.vlgmr.msra.gmra.mxu1 %vm46_vm0, %v601_v35 }
  0x93   :  { %v133_v38 = vsub.f32 %v51_v37, %v51_v37  ;;  %678 = vmatpush3.msra.mxu1 %v791_v3  ;;  %685 = vmatprep.mubr.f32.mxu1 %v124_v36  ;;  %v125_v39 = vsub.f32 %v123_v33, %v124_v36 }
  0x94   :  { %679 = vmatprep.subr.mxu1 %v796_v8 }
  0x95   :  { %680 = vmatpush3.msra.mxu1 %v796_v8  ;;  %v126_v40 = vand.u32 4294901760, %v125_v39  ;;  %v134_v41 = vand.u32 4294901760, %v133_v38 }
  0x96   :  { %681 = vmatprep.subr.mxu1 %v798_v9 }
  0x97   :  { %682 = vmatpush3.msra.mxu1 %v798_v9  ;;  %652 = vmatprep.mubr.f32.mxu0 %v126_v40  ;;  %v135_v42 = vsub.f32 %v133_v38, %v134_v41 }
  0x98   :  { %683 = vmatprep.subr.mxu1 %v800_v10 }
  0x99   :  { %684 = vmatpush3.msra.mxu1 %v800_v10  ;;  %v136_v43 = vand.u32 4294901760, %v135_v42 }
  0x9a   :  { %686 = vmatmul.mubr.f32.vlgmr.msra.gmra.mxu1 %v134_v41  ;;  %699 = vmatprep.subr.mxu1 %v791_v3 }
  0x9b   :  { %700 = vmatpush3.msra.mxu1 %v791_v3  ;;  %707 = vmatprep.mubr.msk.f32.mxu1 %vm46_vm0, %v600_v31 }
  0x9c   :  { %653 = vmatmul.mubr.f32.vlgmr.msra.gmra.mxu0 %v136_v43  ;;  %701 = vmatprep.subr.mxu1 %v796_v8 }
  0x9d   :  { %667 = vmatpush3.msra.mxu0 %v803_v11  ;;  %674 = vmatprep.mubr.f32.mxu0 %v123_v33 }
  0x9e   :  { %668 = vmatprep.subr.mxu0 %v807_v12  ;;  %702 = vmatpush3.msra.mxu1 %v796_v8 }
  0x9f   :  { %669 = vmatpush3.msra.mxu0 %v807_v12  ;;  %703 = vmatprep.subr.mxu1 %v798_v9 }
  0xa0   :  { %670 = vmatprep.subr.mxu0 %v810_v13  ;;  %704 = vmatpush3.msra.mxu1 %v798_v9 }
  0xa1   :  { %671 = vmatpush3.msra.mxu0 %v810_v13  ;;  %705 = vmatprep.subr.mxu1 %v800_v10 }
  0xa2   :  { %672 = vmatprep.subr.mxu0 %v813_v14  ;;  %706 = vmatpush3.msra.mxu1 %v800_v10 }
  0xa3   :  { %673 = vmatpush3.msra.mxu0 %v813_v14  ;;  %708 = vmatmul.mubr.msk.f32.vlgmr.msra.gmra.mxu1 %vm46_vm0, %v601_v35 }
  0xa4   :  { %675 = vmatmul.mubr.f32.vlgmr.msra.gmra.mxu0 %v133_v38  ;;  %688 = vmatprep.subr.mxu0 %v817_v15 }
  0xa5   :  { %689 = vmatpush3.msra.mxu0 %v817_v15  ;;  %696 = vmatprep.mubr.msk.f32.mxu0 %vm46_vm0, %v600_v31 }
  0xa6   :  { %690 = vmatprep.subr.mxu0 %v821_v16 }
  0xa7   :  { %691 = vmatpush3.msra.mxu0 %v821_v16 }
  0xa8   :  { %692 = vmatprep.subr.mxu0 %v824_v17 }
  0xa9   :  { %693 = vmatpush3.msra.mxu0 %v824_v17 }
  0xaa   :  { %694 = vmatprep.subr.mxu0 %v827_v18 }
  0xab   :  { %695 = vmatpush3.msra.mxu0 %v827_v18 }
  0xac   :  { %697 = vmatmul.mubr.msk.f32.vlgmr.msra.gmra.mxu0 %vm46_vm0, %v601_v35 }
 0x152   :  { %v665_v45 = vpop.f32.mrf.mxu1 }
 0x154   :  { %v229_v47 = vpop.f32.mrf.mxu1 }
 0x15a   :  { %v687_v50 = vpop.f32.mrf.mxu1 }
 0x15c   :  { %v654_v44 = vpop.f32.mrf.mxu0  ;;  %v399_v55 = vpop.f32.mrf.mxu1 }
 0x15d   :  { %v236_v49 = vadd.f32 %v665_v45, %v654_v44 }
 0x15e   :  { %v128_v46 = vpop.f32.mrf.mxu0 }
 0x15f   :  { %v230_v52 = vadd.f32 %v229_v47, %v128_v46 }
 0x163   :  { %v709_v57 = vpop.f32.mrf.mxu1 }
 0x164   :  { %v676_v48 = vpop.f32.mrf.mxu0 }
 0x165   :  { %v323_v53 = vadd.f32 %v676_v48, %v236_v49  ;;  %v571_v0 = vpop.f32.mrf.mxu1 }
 0x166   :  { %v315_v51 = vpop.f32.mrf.mxu0 }
 0x167   :  { %v316_v54 = vadd.f32 %v315_v51, %v230_v52  ;;  %v408_v56 = vadd.f32 %v687_v50, %v323_v53 }
 0x169   :  { %v400_v60 = vadd.f32 %v399_v55, %v316_v54 }
 0x16c   :  { %v698_v58 = vpop.f32.mrf.mxu0 }
 0x16d   :  { %v497_v59 = vadd.f32 %v698_v58, %v408_v56 }
 0x16e   :  { %v490_v61 = vpop.f32.mrf.mxu0 }
 0x16f   :  { %v578_v62 = vadd.f32 %v709_v57, %v497_v59  ;;  %v491_v63 = vadd.f32 %v490_v61, %v400_v60 }
 0x171   :  { %582 = vst [vmem:[#allocation5 + $0x8] sm:$0xff] %v578_v62  ;;  %v572_v1 = vadd.f32 %v571_v0, %v491_v63 }
 0x173   :  { %581 = vst [vmem:[#allocation5] sm:$0xff] %v572_v1 }
 0x174   :  { %748 = shalt.err (!%p745_p9)
}
 0x175   :  { %594 = dma.vmem_to_hbm [thread:$0]  %s589_s1, 256, %s890_s2, [#allocation4], %s762_s12, %s762_s12, %s763_s13  }
 0x176   :  { %759 = dma.done.wait [#allocation4], 256  }
 0x177   :  { %760 = vsyncadd [#allocation4], 4294967040 }
 0x178   :  { %598 = vsyncpa [#allocation3], 1 }
 0x179   :  { %599 = vsyncpa [#allocation4], 1 }

</bundles_post_ra>
